<compile_context>
chip_gen: v5e
topology: v5e:2x2
jax: 0.10.0
libtpu: 0.0.40
codegen_flags: <defaults>
</compile_context>

<pallas_src>
import functools

import jax
import jax.numpy as jnp
import numpy as np
from jax import lax
from jax.experimental import pallas as pl
from jax.experimental.pallas import tpu as pltpu

# torchvision Normalize constants from the PyTorch module
_MEAN = np.array([0.4701, 0.4308, 0.3839], dtype=np.float32)
_STD = np.array([0.2595, 0.2522, 0.2541], dtype=np.float32)


def _make_kernel(NB, OH, OW, C_OUT, KC, E_IMG, E_DATE):
    OHW = OH * OW
    NE = E_IMG + E_DATE

    def kernel(x_ref, date_ref, wc_ref, bc_ref, sel_ref, wi_ref, bi_ref,
               wd_ref, bd_ref, out_ref):
        # ---- Conv(3->32, 7x7, stride 2, pad 3): one dense im2col matmul ----
        x = x_ref[...].reshape(NB * OHW, KC)                       # bf16
        conv = jnp.dot(x, wc_ref[...],
                       preferred_element_type=jnp.float32)         # (NB*OHW, 32)
        conv = jnp.maximum(conv + bc_ref[...], 0.0)                 # bias + ReLU

        # ---- MaxPool(3x3, s2, p1) as a separable 3-tap max ----
        # Zero borders are exact because conv >= 0 after the ReLU.
        m = conv.reshape(NB, OH, OW, C_OUT)
        zc = jnp.zeros((NB, OH, 1, C_OUT), jnp.float32)
        left = jnp.concatenate([zc, m[:, :, :OW - 1, :]], axis=2)
        right = jnp.concatenate([m[:, :, 1:, :], zc], axis=2)
        cm = jnp.maximum(m, jnp.maximum(left, right))
        zr = jnp.zeros((NB, 1, OW, C_OUT), jnp.float32)
        up = jnp.concatenate([zr, cm[:, :OH - 1, :, :]], axis=1)
        down = jnp.concatenate([cm[:, 1:, :, :], zr], axis=1)
        mm = jnp.maximum(cm, jnp.maximum(up, down))   # 3x3-window max everywhere

        # ---- GAP over the stride-2 pooled centers: one selection matmul ----
        gap = jnp.dot(sel_ref[...], mm.reshape(NB * OHW, C_OUT),
                      preferred_element_type=jnp.float32)           # (NB, 32)

        # ---- img_linear + ReLU, date_linear + ReLU, concat, single store ----
        h = jnp.maximum(
            jnp.dot(gap, wi_ref[...], preferred_element_type=jnp.float32)
            + bi_ref[...], 0.0)                                      # (NB, E_IMG)
        d = jnp.maximum(
            jnp.dot(date_ref[0], wd_ref[...],
                    preferred_element_type=jnp.float32)
            + bd_ref[...], 0.0)                                      # (NB, E_DATE)
        out_ref[0] = jnp.concatenate([h, d], axis=-1)                # (NB, 64)

    return kernel


def init_params(key, n_input_channels=3, n_embed=64):
    """Deterministic synthetic parameters (shapes follow WeatherEncoder.__init__)."""
    k = jax.random.split(key, 6)
    c = 32
    conv_w = jax.random.normal(k[0], (c, n_input_channels, 1, 7, 7),
                               jnp.float32) * (1.0 / np.sqrt(n_input_channels * 49))
    conv_b = jax.random.normal(k[1], (c,), jnp.float32) * 0.05
    img_w = jax.random.normal(k[2], (c, n_embed - 2), jnp.float32) * (1.0 / np.sqrt(c))
    img_b = jax.random.normal(k[3], (n_embed - 2,), jnp.float32) * 0.05
    date_w = jax.random.normal(k[4], (4, 2), jnp.float32) * 0.5
    date_b = jax.random.normal(k[5], (2,), jnp.float32) * 0.05
    return dict(conv_w=conv_w, conv_b=conv_b, img_w=img_w, img_b=img_b,
                date_w=date_w, date_b=date_b)


def weather_encoder_forward(x, date_feature, params, normalize_input=True):
    """x: (B, T, 3, H, W) float32, date_feature: (B, T, 4) -> (B, T, n_embed)."""
    B, T, C, H, W = x.shape
    assert C == 3
    KH = KW = 7
    PAD, STRIDE, C_OUT = 3, 2, 32
    OH = (H + 2 * PAD - KH) // STRIDE + 1
    OW = (W + 2 * PAD - KW) // STRIDE + 1
    MH = (OH + 2 - 3) // 2 + 1
    MW = (OW + 2 - 3) // 2 + 1
    OHW = OH * OW
    KC = KH * KW * C                      # 147 im2col features
    E_IMG = params["img_w"].shape[1]
    E_DATE = params["date_w"].shape[1]
    NE = E_IMG + E_DATE
    N = B * T

    # Frames per grid step: target ~512 MXU LHS rows, cap 64, no padding if N is small.
    NB = max(1, min(64, 512 // OHW))
    if N <= NB:
        NB = N
    G = -(-N // NB)
    Np = G * NB

    # ---- wrapper-side layout plumbing: normalize, zero-pad, im2col ----
    xf = x.astype(jnp.float32)
    if normalize_input:
        mean = jnp.asarray(_MEAN).reshape(1, 1, 3, 1, 1)
        std = jnp.asarray(_STD).reshape(1, 1, 3, 1, 1)
        xf = (xf - mean) / std
    xf = xf.reshape(N, C, H, W).transpose(0, 2, 3, 1)               # (N, H, W, 3)
    xp = jnp.pad(xf, ((0, 0), (PAD, PAD), (PAD, PAD), (0, 0)))      # zero pad = conv pad
    taps = []
    for kh in range(KH):
        for kw in range(KW):
            taps.append(xp[:, kh:kh + 2 * OH - 1:2, kw:kw + 2 * OW - 1:2, :])
    patches = jnp.stack(taps, axis=3).reshape(N, OHW, KC)           # lanes = (kh, kw, c)
    if Np > N:
        patches = jnp.pad(patches, ((0, Np - N), (0, 0), (0, 0)))
    patches = patches.astype(jnp.bfloat16)

    date = date_feature.astype(jnp.float32).reshape(N, 4)
    if Np > N:
        date = jnp.pad(date, ((0, Np - N), (0, 0)))
    date = date.reshape(G, NB, 4)

    # ---- parameter packing (tiny, grid-invariant, single-buffered) ----
    wmat = jnp.transpose(jnp.squeeze(params["conv_w"], axis=2),
                         (2, 3, 1, 0)).reshape(KC, C_OUT).astype(jnp.bfloat16)
    bconv = params["conv_b"].reshape(1, C_OUT).astype(jnp.float32)
    w_img = params["img_w"].astype(jnp.float32)
    b_img = params["img_b"].reshape(1, E_IMG).astype(jnp.float32)
    w_date = params["date_w"].astype(jnp.float32)
    b_date = params["date_b"].reshape(1, E_DATE).astype(jnp.float32)

    # Selection matrix: for each in-block frame, pick the stride-2 pooled
    # centers (even oh, ow) and average them -> fuses pool stride + GAP.
    sel_np = np.zeros((NB, NB, OH, OW), np.float32)
    inv_area = 1.0 / float(MH * MW)
    for b in range(NB):
        sel_np[b, b, 0:2 * MH:2, 0:2 * MW:2] = inv_area
    pool_sel = jnp.asarray(sel_np.reshape(NB, NB * OHW))

    kernel = _make_kernel(NB, OH, OW, C_OUT, KC, E_IMG, E_DATE)

    # grid-invariant operands: single buffer (no double-buffer DMA)
    const = functools.partial(pl.BlockSpec, pipeline_mode=pl.Buffered(1))

    out = pl.pallas_call(
        kernel,
        out_shape=jax.ShapeDtypeStruct((G, NB, NE), jnp.float32),
        grid=(G,),
        in_specs=[
            pl.BlockSpec((NB, OHW, KC), lambda n: (n, 0, 0)),    # im2col patches
            pl.BlockSpec((1, NB, 4), lambda n: (n, 0, 0)),       # date features
            const((KC, C_OUT), lambda n: (0, 0)),                # conv weight
            const((1, C_OUT), lambda n: (0, 0)),                 # conv bias
            const((NB, NB * OHW), lambda n: (0, 0)),             # pool/GAP selector
            const((C_OUT, E_IMG), lambda n: (0, 0)),             # img_linear W
            const((1, E_IMG), lambda n: (0, 0)),                 # img_linear b
            const((4, E_DATE), lambda n: (0, 0)),                # date_linear W
            const((1, E_DATE), lambda n: (0, 0)),                # date_linear b
        ],
        out_specs=pl.BlockSpec((1, NB, NE), lambda n: (n, 0, 0)),
        compiler_params=pltpu.CompilerParams(
            dimension_semantics=("parallel",)),
    )(patches, date, wmat, bconv, pool_sel, w_img, b_img, w_date, b_date)

    return out.reshape(Np, NE)[:N].reshape(B, T, NE)


def reference_forward(x, date_feature, params, normalize_input=True):
    """Pure-JAX reference mirroring the PyTorch forward (layers=[])."""
    B, T, C, H, W = x.shape
    xf = x.astype(jnp.float32)
    if normalize_input:
        mean = jnp.asarray(_MEAN).reshape(1, 1, 3, 1, 1)
        std = jnp.asarray(_STD).reshape(1, 1, 3, 1, 1)
        xf = (xf - mean) / std
    xi = xf.reshape(B * T, C, H, W)
    w = jnp.squeeze(params["conv_w"], axis=2)                       # (32,3,7,7)
    y = lax.conv_general_dilated(xi, w, window_strides=(2, 2),
                                 padding=((3, 3), (3, 3)),
                                 dimension_numbers=('NCHW', 'OIHW', 'NCHW'))
    y = jnp.maximum(y + params["conv_b"].reshape(1, -1, 1, 1), 0.0)
    y = lax.reduce_window(y, -jnp.inf, lax.max,
                          window_dimensions=(1, 1, 3, 3),
                          window_strides=(1, 1, 2, 2),
                          padding=((0, 0), (0, 0), (1, 1), (1, 1)))
    g = jnp.mean(y, axis=(2, 3))                                    # (N, 32)
    h = jnp.maximum(g @ params["img_w"] + params["img_b"], 0.0)
    d = jnp.maximum(date_feature.reshape(B * T, 4).astype(jnp.float32)
                    @ params["date_w"] + params["date_b"], 0.0)
    out = jnp.concatenate([h, d], axis=1)
    return out.reshape(B, T, -1)


if __name__ == "__main__":
    B, T, C, H, W = 2, 2, 3, 16, 16
    key = jax.random.PRNGKey(0)
    kx, kd, kp = jax.random.split(key, 3)
    x = jax.random.uniform(kx, (B, T, C, H, W), jnp.float32)
    date_feature = jax.random.uniform(kd, (B, T, 4), jnp.float32)
    params = init_params(kp, n_input_channels=3, n_embed=64)

    fwd = jax.jit(weather_encoder_forward)
    out = jax.block_until_ready(fwd(x, date_feature, params))

    ref = reference_forward(x, date_feature, params)
    # bf16 conv path (f32 accumulate) -> loosened tolerance vs f32 reference.
    np.testing.assert_allclose(np.asarray(out), np.asarray(ref),
                               rtol=5e-2, atol=5e-2)
    assert out.shape == (B, T, 64)
    print("KERNEL_OK")
</pallas_src>

<mosaic_0001>
module attributes {stable_mosaic.version = 11 : i64} {
  func.func @kernel(%arg0: i32, %arg1: memref<4x64x147xbf16, #tpu.memory_space<vmem>>, %arg2: memref<1x4x4xf32, #tpu.memory_space<vmem>>, %arg3: memref<147x32xbf16, #tpu.memory_space<vmem>>, %arg4: memref<1x32xf32, #tpu.memory_space<vmem>>, %arg5: memref<4x256xf32, #tpu.memory_space<vmem>>, %arg6: memref<32x62xf32, #tpu.memory_space<vmem>>, %arg7: memref<1x62xf32, #tpu.memory_space<vmem>>, %arg8: memref<4x2xf32, #tpu.memory_space<vmem>>, %arg9: memref<1x2xf32, #tpu.memory_space<vmem>>, %arg10: memref<1x4x64xf32, #tpu.memory_space<vmem>>) attributes {dimension_semantics = [#tpu.dimension_semantics<parallel>], iteration_bounds = array<i64: 1>, scalar_prefetch = 0 : i64, scratch_operands = 0 : i64, tpu.core_type = #tpu.core_type<tc>, window_params = [{transform_indices = @transform_0, window_bounds = array<i64: 4, 64, 147>}, {transform_indices = @transform_1, window_bounds = array<i64: 1, 4, 4>}, {pipeline_mode = #tpu.pipeline_mode<synchronous>, transform_indices = @transform_2, window_bounds = array<i64: 147, 32>}, {pipeline_mode = #tpu.pipeline_mode<synchronous>, transform_indices = @transform_3, window_bounds = array<i64: 1, 32>}, {pipeline_mode = #tpu.pipeline_mode<synchronous>, transform_indices = @transform_4, window_bounds = array<i64: 4, 256>}, {pipeline_mode = #tpu.pipeline_mode<synchronous>, transform_indices = @transform_5, window_bounds = array<i64: 32, 62>}, {pipeline_mode = #tpu.pipeline_mode<synchronous>, transform_indices = @transform_6, window_bounds = array<i64: 1, 62>}, {pipeline_mode = #tpu.pipeline_mode<synchronous>, transform_indices = @transform_7, window_bounds = array<i64: 4, 2>}, {pipeline_mode = #tpu.pipeline_mode<synchronous>, transform_indices = @transform_8, window_bounds = array<i64: 1, 2>}, {transform_indices = @transform_9, window_bounds = array<i64: 1, 4, 64>}]} {
    %c0 = arith.constant 0 : index
    %c0_0 = arith.constant 0 : index
    %c0_1 = arith.constant 0 : index
    %0 = vector.load %arg1[%c0, %c0_0, %c0_1] : memref<4x64x147xbf16, #tpu.memory_space<vmem>>, vector<4x64x147xbf16>
    %1 = vector.shape_cast %0 : vector<4x64x147xbf16> to vector<256x147xbf16>
    %c0_2 = arith.constant 0 : index
    %c0_3 = arith.constant 0 : index
    %2 = vector.load %arg3[%c0_2, %c0_3] : memref<147x32xbf16, #tpu.memory_space<vmem>>, vector<147x32xbf16>
    %cst = arith.constant dense<0.000000e+00> : vector<256x32xf32>
    %3 = tpu.matmul %1, %2, %cst {dimension_numbers = #tpu.dot_dimension_numbers<[1], [0], [0], [1], [0, 0, 1, 1], [], []>} : vector<256x147xbf16>, vector<147x32xbf16>, vector<256x32xf32> -> vector<256x32xf32>
    %c0_4 = arith.constant 0 : index
    %c0_5 = arith.constant 0 : index
    %4 = vector.load %arg4[%c0_4, %c0_5] : memref<1x32xf32, #tpu.memory_space<vmem>>, vector<1x32xf32>
    %5 = vector.broadcast %4 : vector<1x32xf32> to vector<256x32xf32>
    %6 = arith.addf %3, %5 : vector<256x32xf32>
    %cst_6 = arith.constant 0.000000e+00 : f32
    %7 = vector.broadcast %cst_6 : f32 to vector<256x32xf32>
    %8 = arith.maximumf %6, %7 : vector<256x32xf32>
    %9 = vector.shape_cast %8 : vector<256x32xf32> to vector<4x8x8x32xf32>
    %cst_7 = arith.constant 0.000000e+00 : f32
    %10 = vector.broadcast %cst_7 : f32 to vector<4x8x1x32xf32>
    %11 = vector.extract_strided_slice %9 {offsets = [0, 0, 0, 0], sizes = [4, 8, 7, 32], strides = [1, 1, 1, 1]} : vector<4x8x8x32xf32> to vector<4x8x7x32xf32>
    %12 = tpu.concatenate %10, %11 in 2 : vector<4x8x1x32xf32>, vector<4x8x7x32xf32> -> vector<4x8x8x32xf32>
    %13 = vector.extract_strided_slice %9 {offsets = [0, 0, 1, 0], sizes = [4, 8, 7, 32], strides = [1, 1, 1, 1]} : vector<4x8x8x32xf32> to vector<4x8x7x32xf32>
    %14 = tpu.concatenate %13, %10 in 2 : vector<4x8x7x32xf32>, vector<4x8x1x32xf32> -> vector<4x8x8x32xf32>
    %15 = arith.maximumf %12, %14 : vector<4x8x8x32xf32>
    %16 = arith.maximumf %9, %15 : vector<4x8x8x32xf32>
    %cst_8 = arith.constant 0.000000e+00 : f32
    %17 = vector.broadcast %cst_8 : f32 to vector<4x1x8x32xf32>
    %18 = vector.extract_strided_slice %16 {offsets = [0, 0, 0, 0], sizes = [4, 7, 8, 32], strides = [1, 1, 1, 1]} : vector<4x8x8x32xf32> to vector<4x7x8x32xf32>
    %19 = tpu.concatenate %17, %18 in 1 : vector<4x1x8x32xf32>, vector<4x7x8x32xf32> -> vector<4x8x8x32xf32>
    %20 = vector.extract_strided_slice %16 {offsets = [0, 1, 0, 0], sizes = [4, 7, 8, 32], strides = [1, 1, 1, 1]} : vector<4x8x8x32xf32> to vector<4x7x8x32xf32>
    %21 = tpu.concatenate %20, %17 in 1 : vector<4x7x8x32xf32>, vector<4x1x8x32xf32> -> vector<4x8x8x32xf32>
    %22 = arith.maximumf %19, %21 : vector<4x8x8x32xf32>
    %23 = arith.maximumf %16, %22 : vector<4x8x8x32xf32>
    %c0_9 = arith.constant 0 : index
    %c0_10 = arith.constant 0 : index
    %24 = vector.load %arg5[%c0_9, %c0_10] : memref<4x256xf32, #tpu.memory_space<vmem>>, vector<4x256xf32>
    %25 = vector.shape_cast %23 : vector<4x8x8x32xf32> to vector<256x32xf32>
    %cst_11 = arith.constant dense<0.000000e+00> : vector<4x32xf32>
    %26 = tpu.matmul %24, %25, %cst_11 {dimension_numbers = #tpu.dot_dimension_numbers<[1], [0], [0], [1], [0, 0, 1, 1], [], []>} : vector<4x256xf32>, vector<256x32xf32>, vector<4x32xf32> -> vector<4x32xf32>
    %c0_12 = arith.constant 0 : index
    %c0_13 = arith.constant 0 : index
    %27 = vector.load %arg6[%c0_12, %c0_13] : memref<32x62xf32, #tpu.memory_space<vmem>>, vector<32x62xf32>
    %cst_14 = arith.constant dense<0.000000e+00> : vector<4x62xf32>
    %28 = tpu.matmul %26, %27, %cst_14 {dimension_numbers = #tpu.dot_dimension_numbers<[1], [0], [0], [1], [0, 0, 1, 1], [], []>} : vector<4x32xf32>, vector<32x62xf32>, vector<4x62xf32> -> vector<4x62xf32>
    %c0_15 = arith.constant 0 : index
    %c0_16 = arith.constant 0 : index
    %29 = vector.load %arg7[%c0_15, %c0_16] : memref<1x62xf32, #tpu.memory_space<vmem>>, vector<1x62xf32>
    %30 = vector.broadcast %29 : vector<1x62xf32> to vector<4x62xf32>
    %31 = arith.addf %28, %30 : vector<4x62xf32>
    %cst_17 = arith.constant 0.000000e+00 : f32
    %32 = vector.broadcast %cst_17 : f32 to vector<4x62xf32>
    %33 = arith.maximumf %31, %32 : vector<4x62xf32>
    %c0_18 = arith.constant 0 : index
    %c0_19 = arith.constant 0 : index
    %c0_20 = arith.constant 0 : index
    %34 = vector.load %arg2[%c0_18, %c0_19, %c0_20] : memref<1x4x4xf32, #tpu.memory_space<vmem>>, vector<1x4x4xf32>
    %35 = vector.shape_cast %34 : vector<1x4x4xf32> to vector<4x4xf32>
    %c0_21 = arith.constant 0 : index
    %c0_22 = arith.constant 0 : index
    %36 = vector.load %arg8[%c0_21, %c0_22] : memref<4x2xf32, #tpu.memory_space<vmem>>, vector<4x2xf32>
    %cst_23 = arith.constant dense<0.000000e+00> : vector<4x2xf32>
    %37 = tpu.matmul %35, %36, %cst_23 {dimension_numbers = #tpu.dot_dimension_numbers<[1], [0], [0], [1], [0, 0, 1, 1], [], []>} : vector<4x4xf32>, vector<4x2xf32>, vector<4x2xf32> -> vector<4x2xf32>
    %c0_24 = arith.constant 0 : index
    %c0_25 = arith.constant 0 : index
    %38 = vector.load %arg9[%c0_24, %c0_25] : memref<1x2xf32, #tpu.memory_space<vmem>>, vector<1x2xf32>
    %39 = vector.broadcast %38 : vector<1x2xf32> to vector<4x2xf32>
    %40 = arith.addf %37, %39 : vector<4x2xf32>
    %cst_26 = arith.constant 0.000000e+00 : f32
    %41 = vector.broadcast %cst_26 : f32 to vector<4x2xf32>
    %42 = arith.maximumf %40, %41 : vector<4x2xf32>
    %43 = tpu.concatenate %33, %42 in 1 : vector<4x62xf32>, vector<4x2xf32> -> vector<4x64xf32>
    %c0_27 = arith.constant 0 : index
    %c0_28 = arith.constant 0 : index
    %c0_29 = arith.constant 0 : index
    %44 = vector.load %arg10[%c0_27, %c0_28, %c0_29] : memref<1x4x64xf32, #tpu.memory_space<vmem>>, vector<1x4x64xf32>
    %45 = vector.shape_cast %44 : vector<1x4x64xf32> to vector<4x64xf32>
    %46 = vector.shape_cast %43 : vector<4x64xf32> to vector<1x4x64xf32>
    tpu.vector_store %arg10[%c0_27, %c0_28, %c0_29], %46 {strides = array<i32>} : memref<1x4x64xf32, #tpu.memory_space<vmem>>, vector<1x4x64xf32>,
    return
  }
  func.func @transform_0(%arg0: i32) -> (i32, i32, i32) {
    %c0_i32 = arith.constant 0 : i32
    %c0_i32_0 = arith.constant 0 : i32
    %c0_i32_1 = arith.constant 0 : i32
    return %arg0, %c0_i32, %c0_i32_0 : i32, i32, i32
  }
  func.func @transform_1(%arg0: i32) -> (i32, i32, i32) {
    %c0_i32 = arith.constant 0 : i32
    %c0_i32_0 = arith.constant 0 : i32
    %c0_i32_1 = arith.constant 0 : i32
    return %arg0, %c0_i32, %c0_i32_0 : i32, i32, i32
  }
  func.func @transform_2(%arg0: i32) -> (i32, i32) {
    %c0_i32 = arith.constant 0 : i32
    %c0_i32_0 = arith.constant 0 : i32
    %c0_i32_1 = arith.constant 0 : i32
    return %c0_i32, %c0_i32_0 : i32, i32
  }
  func.func @transform_3(%arg0: i32) -> (i32, i32) {
    %c0_i32 = arith.constant 0 : i32
    %c0_i32_0 = arith.constant 0 : i32
    %c0_i32_1 = arith.constant 0 : i32
    return %c0_i32, %c0_i32_0 : i32, i32
  }
  func.func @transform_4(%arg0: i32) -> (i32, i32) {
    %c0_i32 = arith.constant 0 : i32
    %c0_i32_0 = arith.constant 0 : i32
    %c0_i32_1 = arith.constant 0 : i32
    return %c0_i32, %c0_i32_0 : i32, i32
  }
  func.func @transform_5(%arg0: i32) -> (i32, i32) {
    %c0_i32 = arith.constant 0 : i32
    %c0_i32_0 = arith.constant 0 : i32
    %c0_i32_1 = arith.constant 0 : i32
    return %c0_i32, %c0_i32_0 : i32, i32
  }
  func.func @transform_6(%arg0: i32) -> (i32, i32) {
    %c0_i32 = arith.constant 0 : i32
    %c0_i32_0 = arith.constant 0 : i32
    %c0_i32_1 = arith.constant 0 : i32
    return %c0_i32, %c0_i32_0 : i32, i32
  }
  func.func @transform_7(%arg0: i32) -> (i32, i32) {
    %c0_i32 = arith.constant 0 : i32
    %c0_i32_0 = arith.constant 0 : i32
    %c0_i32_1 = arith.constant 0 : i32
    return %c0_i32, %c0_i32_0 : i32, i32
  }
  func.func @transform_8(%arg0: i32) -> (i32, i32) {
    %c0_i32 = arith.constant 0 : i32
    %c0_i32_0 = arith.constant 0 : i32
    %c0_i32_1 = arith.constant 0 : i32
    return %c0_i32, %c0_i32_0 : i32, i32
  }
  func.func @transform_9(%arg0: i32) -> (i32, i32, i32) {
    %c0_i32 = arith.constant 0 : i32
    %c0_i32_0 = arith.constant 0 : i32
    %c0_i32_1 = arith.constant 0 : i32
    return %arg0, %c0_i32, %c0_i32_0 : i32, i32, i32
  }
}

</mosaic_0001>

<bundles_post_ra>
// kernel: weather_encoder_forward.1
= control target key start
LH: loop header
LB: loop body
LE: loop exit
PB: predicated region body
PF: predicated region fallthrough
CT: control target
= control target key end

     0   :  { %vm339_vm0 = vcmask 1040384   ;;  %vm340_vm1 = vcmask 1041408   ;;  %v1314_v4 = vmov 65535   ;;  %s1917_s0 = inlined_call_operand.vmem [shape: bf16[4,64,147], index: 0, kind: input, shape index: {}]   ;;  %s1918_s1 = inlined_call_operand.vmem [shape: f32[1,4,4], index: 1, kind: input, shape index: {}]   ;;  %s1919_s2 = inlined_call_operand.vmem [shape: bf16[147,32], index: 2, kind: input, shape index: {}]   ;;  %s1920_s3 = inlined_call_operand.vmem [shape: f32[1,32], index: 3, kind: input, shape index: {}]   ;;  %s1921_s4 = inlined_call_operand.vmem [shape: f32[4,256], index: 4, kind: input, shape index: {}]   ;;  %s1922_s5 = inlined_call_operand.vmem [shape: f32[32,62], index: 5, kind: input, shape index: {}]   ;;  %s1923_s6 = inlined_call_operand.vmem [shape: f32[1,62], index: 6, kind: input, shape index: {}]   ;;  %s1924_s7 = inlined_call_operand.vmem [shape: f32[4,2], index: 7, kind: input, shape index: {}]   ;;  %s1925_s8 = inlined_call_operand.vmem [shape: f32[1,2], index: 8, kind: input, shape index: {}]   ;;  %s1926_s9 = inlined_call_operand.hbm [shape: f32[1,4,64], index: 9, kind: output, shape index: {}]  }
   0x1   :  { %v1270_v0 = vld [vmem:[%s1919_s2 + $0x38] sm:$0xff]  ;;  %v84_v1 = vld [vmem:[%s1919_s2 + $0x48] sm:$0x3]  ;;  %v1269_v3 = vld [vmem:[%s1919_s2 + $0x30] sm:$0xff]  ;;  %v341_v5 = vsel %vm339_vm0, 4294967295, %v1314_v4 }
   0x2   :  { %v270_v2 = vunpack.c.l.b16 %v84_v1  ;;  %346 = vmatpush.bf16.msra.mxu0 %v1270_v0  ;;  %1272 = vmatpush.bf16.msra.mxu2 %v1270_v0  ;;  %v342_v7 = vsel %vm340_vm1, %v341_v5, 0  ;;  %v1268_v9 = vld [vmem:[%s1919_s2 + $0x28] sm:$0xff]  ;;  %v1271_v10 = vld [vmem:[%s1919_s2 + $0x40] sm:$0xff] }
   0x3   :  { %v1231_v11 = vld [vmem:[%s1917_s0 + $0x4] sm:$0xf]  ;;  %v1052_v12 = vld [vmem:[%s1917_s0 + $0x8] sm:$0xf0] }
   0x4   :  { %v280_v6 = vpack.c.b16 %v270_v2, %v270_v2 }
   0x6   :  { %v344_v8 = vand.u32 %v342_v7, %v280_v6  ;;  %347 = vmatpush.bf16.msra.mxu0 %v1269_v3  ;;  %1273 = vmatpush.bf16.msra.mxu2 %v1269_v3 }
   0x8   :  { %441 = vmatpush.bf16.msra.mxu1 %v344_v8  ;;  %1280 = vmatpush.bf16.msra.mxu3 %v344_v8 }
   0x9   :  { %14 = vsyncpa [#allocation3], 0  ;;  %v1055_v13 = vor.u32 %v1231_v11, %v1052_v12  ;;  %v1267_v14 = vld [vmem:[%s1919_s2 + $0x20] sm:$0xff]  ;;  %vm290_vm2 = vcmask 154624   ;;  %v1266_v15 = vld [vmem:[%s1919_s2 + $0x18] sm:$0xff]  ;;  %vm748_vm3 = vcmask 1046528  }
   0xa   :  { %348 = vmatpush.bf16.msra.mxu0 %v1268_v9  ;;  %1274 = vmatpush.bf16.msra.mxu2 %v1268_v9  ;;  %v1251_v16 = vld [vmem:[%s1917_s0 + $0xa4] sm:$0xf]  ;;  %v1132_v17 = vld [vmem:[%s1917_s0 + $0xa8] sm:$0xf0]  ;;  %v1265_v18 = vld [vmem:[%s1919_s2 + $0x10] sm:$0xff]  ;;  %vm999_vm4 = vcmask 1043456  }
   0xb   :  { %v1135_v19 = vor.u32 %v1251_v16, %v1132_v17  ;;  %v1264_v20 = vld [vmem:[%s1919_s2 + $0x8] sm:$0xff]  ;;  %v1233_v21 = vld [vmem:[%s1917_s0 + $0x14] sm:$0xf]  ;;  %v1060_v22 = vld [vmem:[%s1917_s0 + $0x18] sm:$0xf0]  ;;  %vm995_vm5 = vcmask 31744  }
   0xc   :  { %442 = vmatpush.bf16.msra.mxu1 %v1271_v10  ;;  %1281 = vmatpush.bf16.msra.mxu3 %v1271_v10  ;;  %v1063_v23 = vor.u32 %v1233_v21, %v1060_v22  ;;  %v1263_v24 = vld [vmem:[%s1919_s2] sm:$0xff]  ;;  %v1232_v26 = vld [vmem:[%s1917_s0 + $0x4] sm:$0xf0]  ;;  %v1122_v27 = vld [vmem:[%s1917_s0 + $0x90] sm:$0xf]  ;;  %vm964_vm6 = vcmask 261120  }
   0xd   :  { %v1050_v25 = vld [vmem:[%s1917_s0] sm:$0xf]  ;;  %v1250_v28 = vld [vmem:[%s1917_s0 + $0x94] sm:$0xf0]  ;;  %v1253_v31 = vld [vmem:[%s1917_s0 + $0xb4] sm:$0xf] }
   0xe   :  { %349 = vmatpush.bf16.msra.mxu0 %v1267_v14  ;;  %1275 = vmatpush.bf16.msra.mxu2 %v1267_v14  ;;  %v1051_v29 = vor.u32 %v1232_v26, %v1050_v25  ;;  %v1123_v30 = vor.u32 %v1250_v28, %v1122_v27  ;;  %v1140_v32 = vld [vmem:[%s1917_s0 + $0xb8] sm:$0xf0]  ;;  %v1235_v34 = vld [vmem:[%s1917_s0 + $0x24] sm:$0xf]  ;;  %v1068_v35 = vld [vmem:[%s1917_s0 + $0x28] sm:$0xf0] }
   0xf   :  { %1212 = vmatmul.msk.bf16.vlgmr.msra.gmra.mxu1 %vm290_vm2, %v1055_v13  ;;  %1222 = vmatmul.msk.bf16.vlgmr.msra.gmra.mxu3 %vm290_vm2, %v1135_v19  ;;  %v1143_v33 = vor.u32 %v1253_v31, %v1140_v32  ;;  %v1071_v36 = vor.u32 %v1235_v34, %v1068_v35  ;;  %v1058_v37 = vld [vmem:[%s1917_s0 + $0x10] sm:$0xf]  ;;  %v1234_v38 = vld [vmem:[%s1917_s0 + $0x14] sm:$0xf0]  ;;  %v1130_v39 = vld [vmem:[%s1917_s0 + $0xa0] sm:$0xf] }
  0x10   :  { %v1252_v40 = vld [vmem:[%s1917_s0 + $0xa4] sm:$0xf0]  ;;  %v1059_v41 = vor.u32 %v1234_v38, %v1058_v37  ;;  %v1255_v43 = vld [vmem:[%s1917_s0 + $0xc4] sm:$0xf]  ;;  %v1148_v44 = vld [vmem:[%s1917_s0 + $0xc8] sm:$0xf0] }
  0x11   :  { %v1131_v42 = vor.u32 %v1252_v40, %v1130_v39  ;;  %v1151_v45 = vor.u32 %v1255_v43, %v1148_v44  ;;  %v1237_v46 = vld [vmem:[%s1917_s0 + $0x34] sm:$0xf]  ;;  %v1076_v47 = vld [vmem:[%s1917_s0 + $0x38] sm:$0xf0]  ;;  %v1066_v49 = vld [vmem:[%s1917_s0 + $0x20] sm:$0xf] }
  0x12   :  { %350 = vmatpush.bf16.msra.mxu0 %v1266_v15  ;;  %1276 = vmatpush.bf16.msra.mxu2 %v1266_v15  ;;  %v1079_v48 = vor.u32 %v1237_v46, %v1076_v47  ;;  %v1236_v50 = vld [vmem:[%s1917_s0 + $0x24] sm:$0xf0]  ;;  %v1138_v51 = vld [vmem:[%s1917_s0 + $0xb0] sm:$0xf]  ;;  %v1254_v52 = vld [vmem:[%s1917_s0 + $0xb4] sm:$0xf0] }
  0x13   :  { %v1067_v53 = vor.u32 %v1236_v50, %v1066_v49  ;;  %v1139_v54 = vor.u32 %v1254_v52, %v1138_v51  ;;  %v1257_v55 = vld [vmem:[%s1917_s0 + $0xd4] sm:$0xf]  ;;  %v1156_v56 = vld [vmem:[%s1917_s0 + $0xd8] sm:$0xf0]  ;;  %v1239_v58 = vld [vmem:[%s1917_s0 + $0x44] sm:$0xf] }
  0x14   :  { %v1159_v57 = vor.u32 %v1257_v55, %v1156_v56  ;;  %v1084_v59 = vld [vmem:[%s1917_s0 + $0x48] sm:$0xf0]  ;;  %v1074_v61 = vld [vmem:[%s1917_s0 + $0x30] sm:$0xf]  ;;  %v1238_v62 = vld [vmem:[%s1917_s0 + $0x34] sm:$0xf0] }
  0x15   :  { %v1087_v60 = vor.u32 %v1239_v58, %v1084_v59  ;;  %v1146_v63 = vld [vmem:[%s1917_s0 + $0xc0] sm:$0xf]  ;;  %v1256_v0 = vld [vmem:[%s1917_s0 + $0xc4] sm:$0xf0]  ;;  %v1075_v1 = vor.u32 %v1238_v62, %v1074_v61  ;;  %v1259_v3 = vld [vmem:[%s1917_s0 + $0xe4] sm:$0xf] }
  0x16   :  { %351 = vmatpush.bf16.msra.mxu0 %v1265_v18  ;;  %1277 = vmatpush.bf16.msra.mxu2 %v1265_v18  ;;  %v1147_v2 = vor.u32 %v1256_v0, %v1146_v63  ;;  %v1164_v4 = vld [vmem:[%s1917_s0 + $0xe8] sm:$0xf0]  ;;  %v1241_v6 = vld [vmem:[%s1917_s0 + $0x54] sm:$0xf]  ;;  %v1092_v7 = vld [vmem:[%s1917_s0 + $0x58] sm:$0xf0] }
  0x17   :  { %v1167_v5 = vor.u32 %v1259_v3, %v1164_v4  ;;  %v1095_v8 = vor.u32 %v1241_v6, %v1092_v7  ;;  %v1082_v9 = vld [vmem:[%s1917_s0 + $0x40] sm:$0xf]  ;;  %v1240_v10 = vld [vmem:[%s1917_s0 + $0x44] sm:$0xf0]  ;;  %v1154_v11 = vld [vmem:[%s1917_s0 + $0xd0] sm:$0xf] }
  0x18   :  { %v1258_v12 = vld [vmem:[%s1917_s0 + $0xd4] sm:$0xf0]  ;;  %v1083_v13 = vor.u32 %v1240_v10, %v1082_v9  ;;  %v1261_v15 = vld [vmem:[%s1917_s0 + $0xf4] sm:$0xf]  ;;  %v1172_v16 = vld [vmem:[%s1917_s0 + $0xf8] sm:$0xf0] }
  0x19   :  { %v1155_v14 = vor.u32 %v1258_v12, %v1154_v11  ;;  %v1175_v17 = vor.u32 %v1261_v15, %v1172_v16  ;;  %v1243_v18 = vld [vmem:[%s1917_s0 + $0x64] sm:$0xf]  ;;  %v1100_v19 = vld [vmem:[%s1917_s0 + $0x68] sm:$0xf0]  ;;  %v1090_v21 = vld [vmem:[%s1917_s0 + $0x50] sm:$0xf] }
  0x1a   :  { %352 = vmatpush.bf16.msra.mxu0 %v1264_v20  ;;  %1278 = vmatpush.bf16.msra.mxu2 %v1264_v20  ;;  %v1103_v20 = vor.u32 %v1243_v18, %v1100_v19  ;;  %v1242_v22 = vld [vmem:[%s1917_s0 + $0x54] sm:$0xf0]  ;;  %v1245_v27 = vld [vmem:[%s1917_s0 + $0x74] sm:$0xf]  ;;  %v1108_v28 = vld [vmem:[%s1917_s0 + $0x78] sm:$0xf0] }
  0x1b   :  { %v1091_v25 = vor.u32 %v1242_v22, %v1090_v21  ;;  %v1244_v31 = vld [vmem:[%s1917_s0 + $0x64] sm:$0xf0]  ;;  %v1170_v32 = vld [vmem:[%s1917_s0 + $0xf0] sm:$0xf]  ;;  %v1116_v37 = vld [vmem:[%s1917_s0 + $0x88] sm:$0xf0] }
  0x1c   :  { %v1106_v39 = vld [vmem:[%s1917_s0 + $0x70] sm:$0xf]  ;;  %v1246_v40 = vld [vmem:[%s1917_s0 + $0x74] sm:$0xf0]  ;;  %v1249_v44 = vld [vmem:[%s1917_s0 + $0x94] sm:$0xf] }
  0x1d   :  { %v1114_v47 = vld [vmem:[%s1917_s0 + $0x80] sm:$0xf]  ;;  %s1315_s17 = smov 62   ;;  %vm1028_vm7 = vcmask 506880   ;;  %vm1030_vm8 = vcmask 519168  }
  0x1e   :  { %353 = vmatpush.bf16.msra.mxu0 %v1263_v24  ;;  %1279 = vmatpush.bf16.msra.mxu2 %v1263_v24  ;;  %v1260_v24 = vld [vmem:[%s1917_s0 + $0xe4] sm:$0xf0]  ;;  %v1608_v50 = vld [vmem:[%s1920_s3] ss:$0 sm:$0xff] }
  0x1f   :  { %1213 = vmatmul.msk.bf16.gmra.mxu1 %vm290_vm2, %v1063_v23  ;;  %1223 = vmatmul.msk.bf16.gmra.mxu3 %vm290_vm2, %v1143_v33  ;;  %v1162_v23 = vld [vmem:[%s1917_s0 + $0xe0] sm:$0xf]  ;;  %v1262_v33 = vld [vmem:[%s1917_s0 + $0xf4] sm:$0xf0] }
  0x20   :  { %v1163_v26 = vor.u32 %v1260_v24, %v1162_v23  ;;  %v1171_v35 = vor.u32 %v1262_v33, %v1170_v32 }
  0x21   :  { %354 = vmatmul.bf16.vlgmr.msra.gmra.mxu0 %v1051_v29  ;;  %399 = vmatmul.bf16.vlgmr.msra.gmra.mxu2 %v1123_v30  ;;  %v1111_v29 = vor.u32 %v1245_v27, %v1108_v28  ;;  %v1098_v30 = vld [vmem:[%s1917_s0 + $0x60] sm:$0xf] }
  0x22   :  { %v1099_v34 = vor.u32 %v1244_v31, %v1098_v30 }
  0x2f   :  { %1214 = vmatmul.msk.bf16.gmra.mxu1 %vm290_vm2, %v1071_v36  ;;  %1224 = vmatmul.msk.bf16.gmra.mxu3 %vm290_vm2, %v1151_v45  ;;  %v1247_v36 = vld [vmem:[%s1917_s0 + $0x84] sm:$0xf]  ;;  %v1124_v45 = vld [vmem:[%s1917_s0 + $0x98] sm:$0xf0] }
  0x30   :  { %v1119_v38 = vor.u32 %v1247_v36, %v1116_v37  ;;  %v1127_v46 = vor.u32 %v1249_v44, %v1124_v45 }
  0x31   :  { %359 = vmatmul.bf16.gmra.mxu0 %v1059_v41  ;;  %404 = vmatmul.bf16.gmra.mxu2 %v1131_v42  ;;  %v1107_v42 = vor.u32 %v1246_v40, %v1106_v39 }
  0x3f   :  { %1215 = vmatmul.msk.bf16.gmra.mxu1 %vm290_vm2, %v1079_v48  ;;  %1225 = vmatmul.msk.bf16.gmra.mxu3 %vm290_vm2, %v1159_v57  ;;  %v1248_v48 = vld [vmem:[%s1917_s0 + $0x84] sm:$0xf0] }
  0x40   :  { %v1115_v51 = vor.u32 %v1248_v48, %v1114_v47 }
  0x41   :  { %364 = vmatmul.bf16.gmra.mxu0 %v1067_v53  ;;  %409 = vmatmul.bf16.gmra.mxu2 %v1139_v54 }
  0x4f   :  { %1216 = vmatmul.msk.bf16.gmra.mxu1 %vm290_vm2, %v1087_v60  ;;  %1226 = vmatmul.msk.bf16.gmra.mxu3 %vm290_vm2, %v1167_v5 }
  0x51   :  { %369 = vmatmul.bf16.gmra.mxu0 %v1075_v1  ;;  %414 = vmatmul.bf16.gmra.mxu2 %v1147_v2 }
  0x5f   :  { %1217 = vmatmul.msk.bf16.gmra.mxu1 %vm290_vm2, %v1095_v8  ;;  %1227 = vmatmul.msk.bf16.gmra.mxu3 %vm290_vm2, %v1175_v17 }
  0x61   :  { %374 = vmatmul.bf16.gmra.mxu0 %v1083_v13  ;;  %419 = vmatmul.bf16.gmra.mxu2 %v1155_v14 }
  0x6f   :  { %1218 = vmatmul.msk.bf16.gmra.mxu1 %vm290_vm2, %v1103_v20 }
  0x71   :  { %379 = vmatmul.bf16.gmra.mxu0 %v1091_v25  ;;  %424 = vmatmul.bf16.gmra.mxu2 %v1163_v26 }
  0x7f   :  { %1219 = vmatmul.msk.bf16.gmra.mxu1 %vm290_vm2, %v1111_v29 }
  0x81   :  { %384 = vmatmul.bf16.gmra.mxu0 %v1099_v34  ;;  %429 = vmatmul.bf16.gmra.mxu2 %v1171_v35 }
  0x8c   :  { %v444_v41 = vpop.f32.mrf.mxu1 }
  0x8f   :  { %1220 = vmatmul.msk.bf16.gmra.mxu1 %vm290_vm2, %v1119_v38 }
  0x91   :  { %389 = vmatmul.bf16.gmra.mxu0 %v1107_v42 }
  0x92   :  { %v494_v54 = vpop.f32.mrf.mxu3 }
  0x94   :  { %v446_v43 = vpop.f32.mrf.mxu1 }
  0x9a   :  { %v496_v0 = vpop.f32.mrf.mxu3 }
  0x9c   :  { %v449_v49 = vpop.f32.mrf.mxu1 }
  0x9e   :  { %v355_v52 = vpop.f32.mrf.mxu0 }
  0x9f   :  { %1221 = vmatmul.msk.bf16.gmra.mxu1 %vm290_vm2, %v1127_v46  ;;  %v356_v53 = vadd.f32 %v1608_v50, %v355_v52 }
  0xa1   :  { %v445_v55 = vadd.f32 %v444_v41, %v356_v53  ;;  %394 = vmatmul.bf16.gmra.mxu0 %v1115_v51 }
  0xa2   :  { %v499_v18 = vpop.f32.mrf.mxu3 }
  0xa3   :  { %v524_v57 = vmax.f32 %v445_v55, 0.0 }
  0xa4   :  { %v451_v56 = vpop.f32.mrf.mxu1  ;;  %v1612_v58 = vpop.f32.mrf.mxu2 }
  0xa5   :  { %v588_v61 = vrot.slane %v524_v57, 7  ;;  %v684_v62 = vrot.slane %v524_v57, 1 }
  0xa6   :  { %v357_v59 = vpop.f32.mrf.mxu0 }
  0xa7   :  { %v358_v60 = vadd.f32 %v1608_v50, %v357_v59  ;;  %v652_v6 = vsel %vm339_vm0, 0.0, %v588_v61  ;;  %v749_v7 = vsel %vm748_vm3, %v684_v62, 0.0 }
  0xa8   :  { %v781_v13 = vmax.f32 %v652_v6, %v749_v7 }
  0xa9   :  { %v447_v63 = vadd.f32 %v446_v43, %v358_v60 }
  0xaa   :  { %v813_v19 = vmax.f32 %v524_v57, %v781_v13  ;;  %v501_v40 = vpop.f32.mrf.mxu3 }
  0xab   :  { %v525_v1 = vmax.f32 %v447_v63, 0.0 }
  0xac   :  { %v454_v2 = vpop.f32.mrf.mxu1  ;;  %v1615_v5 = vpop.f32.mrf.mxu2 }
  0xad   :  { %v589_v3 = vrot.slane %v525_v1, 7  ;;  %v685_v4 = vrot.slane %v525_v1, 1 }
  0xae   :  { %v360_v8 = vpop.f32.mrf.mxu0 }
  0xaf   :  { %v653_v9 = vsel %vm339_vm0, 0.0, %v589_v3  ;;  %v750_v10 = vsel %vm748_vm3, %v685_v4, 0.0  ;;  %v361_v11 = vadd.f32 %v1608_v50, %v360_v8 }
  0xb0   :  { %v782_v12 = vmax.f32 %v653_v9, %v750_v10 }
  0xb1   :  { %v450_v14 = vadd.f32 %v449_v49, %v361_v11 }
  0xb2   :  { %v814_v15 = vmax.f32 %v525_v1, %v782_v12  ;;  %v504_v8 = vpop.f32.mrf.mxu3 }
  0xb3   :  { %v526_v16 = vmax.f32 %v450_v14, 0.0 }
  0xb4   :  { %v456_v17 = vpop.f32.mrf.mxu1  ;;  %v845_v20 = vmax.f32 %v814_v15, 0.0  ;;  %v405_v23 = vpop.f32.mrf.mxu2 }
  0xb5   :  { %v590_v21 = vrot.slane %v526_v16, 7  ;;  %v686_v22 = vrot.slane %v526_v16, 1  ;;  %v406_v24 = vadd.f32 %v1608_v50, %v405_v23 }
  0xb6   :  { %v362_v25 = vpop.f32.mrf.mxu0  ;;  %v1623_v26 = vmax.f32 %v813_v19, %v845_v20 }
  0xb7   :  { %v654_v27 = vsel %vm339_vm0, 0.0, %v590_v21  ;;  %v751_v28 = vsel %vm748_vm3, %v686_v22, 0.0  ;;  %v363_v29 = vadd.f32 %v1608_v50, %v362_v25  ;;  %v495_v31 = vadd.f32 %v494_v54, %v406_v24 }
  0xb8   :  { %v783_v30 = vmax.f32 %v654_v27, %v751_v28 }
  0xb9   :  { %v452_v32 = vadd.f32 %v451_v56, %v363_v29  ;;  %v544_v49 = vmax.f32 %v495_v31, 0.0 }
  0xba   :  { %v815_v33 = vmax.f32 %v526_v16, %v783_v30 }
  0xbb   :  { %v527_v34 = vmax.f32 %v452_v32, 0.0  ;;  %v608_v57 = vrot.slane %v544_v49, 7  ;;  %v704_v59 = vrot.slane %v544_v49, 1 }
  0xbc   :  { %v1628_v35 = vpop.f32.mrf.mxu1  ;;  %v846_v36 = vmax.f32 %v813_v19, %v815_v33  ;;  %v407_v39 = vpop.f32.mrf.mxu2 }
  0xbd   :  { %v591_v37 = vrot.slane %v527_v34, 7  ;;  %v687_v38 = vrot.slane %v527_v34, 1  ;;  %v408_v41 = vadd.f32 %v1608_v50, %v407_v39  ;;  %v672_v11 = vsel %vm339_vm0, 0.0, %v608_v57 }
  0xbe   :  { %v365_v42 = vpop.f32.mrf.mxu0  ;;  %v1631_v43 = vmax.f32 %v814_v15, %v846_v36  ;;  %v769_v12 = vsel %vm748_vm3, %v704_v59, 0.0 }
  0xbf   :  { %v655_v44 = vsel %vm339_vm0, 0.0, %v591_v37  ;;  %v752_v45 = vsel %vm748_vm3, %v687_v38, 0.0  ;;  %v366_v46 = vadd.f32 %v1608_v50, %v365_v42  ;;  %v497_v48 = vadd.f32 %v496_v0, %v408_v41 }
  0xc0   :  { %v784_v47 = vmax.f32 %v655_v44, %v752_v45 }
  0xc1   :  { %v455_v51 = vadd.f32 %v454_v2, %v366_v46  ;;  %v545_v53 = vmax.f32 %v497_v48, 0.0  ;;  %v1668_v46 = vpop.f32.mrf.mxu3 }
  0xc2   :  { %v1636_v52 = vmax.f32 %v527_v34, %v784_v47 }
  0xc3   :  { %v528_v54 = vmax.f32 %v455_v51, 0.0  ;;  %v609_v63 = vrot.slane %v545_v53, 7  ;;  %v705_v1 = vrot.slane %v545_v53, 1 }
  0xc4   :  { %v1638_v55 = vpop.f32.mrf.mxu1  ;;  %v847_v56 = vmax.f32 %v814_v15, %v1636_v52  ;;  %v410_v62 = vpop.f32.mrf.mxu2 }
  0xc5   :  { %v592_v60 = vrot.slane %v528_v54, 7  ;;  %v688_v61 = vrot.slane %v528_v54, 1  ;;  %v411_v3 = vadd.f32 %v1608_v50, %v410_v62  ;;  %v673_v15 = vsel %vm339_vm0, 0.0, %v609_v63 }
  0xc6   :  { %v367_v0 = vpop.f32.mrf.mxu0  ;;  %v1642_v4 = vmax.f32 %v815_v33, %v847_v56  ;;  %v770_v16 = vsel %vm748_vm3, %v705_v1, 0.0 }
  0xc7   :  { %v656_v2 = vsel %vm339_vm0, 0.0, %v592_v60  ;;  %v753_v6 = vsel %vm748_vm3, %v688_v61, 0.0  ;;  %v368_v7 = vadd.f32 %v1608_v50, %v367_v0  ;;  %v500_v10 = vadd.f32 %v499_v18, %v411_v3 }
  0xc8   :  { %v785_v9 = vmax.f32 %v656_v2, %v753_v6  ;;  %v801_v18 = vmax.f32 %v672_v11, %v769_v12  ;;  %v802_v25 = vmax.f32 %v673_v15, %v770_v16 }
  0xc9   :  { %v457_v13 = vadd.f32 %v456_v17, %v368_v7  ;;  %v546_v19 = vmax.f32 %v500_v10, 0.0 }
  0xca   :  { %v1649_v14 = vmax.f32 %v528_v54, %v785_v9  ;;  %v1665_v42 = vmax.f32 %v544_v49, %v801_v18  ;;  %v1670_v51 = vmax.f32 %v545_v53, %v802_v25 }
  0xcb   :  { %v529_v20 = vmax.f32 %v457_v13, 0.0  ;;  %v610_v22 = vrot.slane %v546_v19, 7  ;;  %v706_v23 = vrot.slane %v546_v19, 1 }
  0xcc   :  { %v1653_v21 = vpop.f32.mrf.mxu1  ;;  %v848_v24 = vmax.f32 %v815_v33, %v1649_v14  ;;  %v412_v29 = vpop.f32.mrf.mxu2 }
  0xcd   :  { %v593_v27 = vrot.slane %v529_v20, 7  ;;  %v689_v28 = vrot.slane %v529_v20, 1  ;;  %v674_v17 = vsel %vm339_vm0, 0.0, %v610_v22  ;;  %v771_v30 = vsel %vm748_vm3, %v706_v23, 0.0 }
  0xce   :  { %v413_v31 = vadd.f32 %v1608_v50, %v412_v29  ;;  %v370_v32 = vpop.f32.mrf.mxu0  ;;  %v1660_v34 = vmax.f32 %v1636_v52, %v848_v24  ;;  %v803_v33 = vmax.f32 %v674_v17, %v771_v30 }
  0xcf   :  { %v657_v36 = vsel %vm339_vm0, 0.0, %v593_v27  ;;  %v754_v37 = vsel %vm748_vm3, %v689_v28, 0.0  ;;  %v371_v38 = vadd.f32 %v1608_v50, %v370_v32 }
  0xd0   :  { %v786_v39 = vmax.f32 %v657_v36, %v754_v37  ;;  %v502_v41 = vadd.f32 %v501_v40, %v413_v31  ;;  %v835_v44 = vmax.f32 %v546_v19, %v803_v33 }
  0xd1   :  { %v460_v45 = vadd.f32 %v1628_v35, %v371_v38 }
  0xd2   :  { %v818_v47 = vmax.f32 %v529_v20, %v786_v39  ;;  %v547_v48 = vmax.f32 %v502_v41, 0.0  ;;  %v866_v57 = vmax.f32 %v1665_v42, %v835_v44  ;;  %v868_v63 = vmax.f32 %v835_v44, 0.0  ;;  %v1689_v20 = vpop.f32.mrf.mxu3 }
  0xd3   :  { %v530_v54 = vmax.f32 %v460_v45, 0.0 }
  0xd4   :  { %v466_v56 = vpop.f32.mrf.mxu1  ;;  %v611_v59 = vrot.slane %v547_v48, 7  ;;  %v707_v60 = vrot.slane %v547_v48, 1  ;;  %v849_v61 = vmax.f32 %v1636_v52, %v818_v47  ;;  %v415_v62 = vpop.f32.mrf.mxu2  ;;  %v1675_v35 = vmax.f32 %v1670_v51, %v866_v57 }
  0xd5   :  { %v594_v40 = vrot.slane %v530_v54, 7  ;;  %v690_v49 = vrot.slane %v530_v54, 1  ;;  %v416_v1 = vadd.f32 %v1608_v50, %v415_v62 }
  0xd6   :  { %v372_v3 = vpop.f32.mrf.mxu0  ;;  %v675_v53 = vsel %vm339_vm0, 0.0, %v611_v59  ;;  %v772_v0 = vsel %vm748_vm3, %v707_v60, 0.0  ;;  %v1681_v2 = vmax.f32 %v1649_v14, %v849_v61 }
  0xd7   :  { %v658_v6 = vsel %vm339_vm0, 0.0, %v594_v40  ;;  %v755_v52 = vsel %vm748_vm3, %v690_v49, 0.0  ;;  %v373_v7 = vadd.f32 %v1608_v50, %v372_v3  ;;  %v804_v9 = vmax.f32 %v675_v53, %v772_v0 }
  0xd8   :  { %v787_v10 = vmax.f32 %v658_v6, %v755_v52  ;;  %v1686_v11 = vadd.f32 %v504_v8, %v416_v1 }
  0xd9   :  { %v462_v12 = vadd.f32 %v1638_v55, %v373_v7  ;;  %v836_v13 = vmax.f32 %v547_v48, %v804_v9 }
  0xda   :  { %v819_v15 = vmax.f32 %v530_v54, %v787_v10 }
  0xdb   :  { %v531_v16 = vmax.f32 %v462_v12, 0.0  ;;  %v1691_v22 = vmax.f32 %v836_v13, %v868_v63  ;;  %v867_v23 = vmax.f32 %v1670_v51, %v836_v13 }
  0xdc   :  { %v469_v19 = vpop.f32.mrf.mxu1  ;;  %v850_v24 = vmax.f32 %v1649_v14, %v819_v15  ;;  %v1695_v27 = vpop.f32.mrf.mxu2  ;;  %v852_v14 = vmax.f32 %v819_v15, 0.0 }
  0xdd   :  { %v595_v18 = vrot.slane %v531_v16, 7  ;;  %v691_v25 = vrot.slane %v531_v16, 1  ;;  %v1697_v8 = vmax.f32 %v835_v44, %v867_v23  ;;  %v1707_v44 = vpop.f32.mrf.mxu3 }
  0xde   :  { %v375_v28 = vpop.f32.mrf.mxu0  ;;  %v1699_v55 = vmax.f32 %v818_v47, %v850_v24 }
  0xdf   :  { %v376_v29 = vadd.f32 %v1608_v50, %v375_v28  ;;  %v659_v17 = vsel %vm339_vm0, 0.0, %v595_v18  ;;  %v756_v30 = vsel %vm748_vm3, %v691_v25, 0.0 }
  0xe0   :  { %v788_v31 = vmax.f32 %v659_v17, %v756_v30 }
  0xe1   :  { %v465_v32 = vadd.f32 %v1653_v21, %v376_v29 }
  0xe2   :  { %v820_v36 = vmax.f32 %v531_v16, %v788_v31 }
  0xe3   :  { %v532_v39 = vmax.f32 %v465_v32, 0.0  ;;  %v548_v32 = vmax.f32 %v1686_v11, 0.0 }
  0xe4   :  { %v471_v37 = vpop.f32.mrf.mxu1  ;;  %v1705_v33 = vmax.f32 %v820_v36, %v852_v14  ;;  %v851_v38 = vmax.f32 %v818_v47, %v820_v36  ;;  %v420_v41 = vpop.f32.mrf.mxu2 }
  0xe5   :  { %v596_v57 = vrot.slane %v532_v39, 7  ;;  %v692_v59 = vrot.slane %v532_v39, 1  ;;  %v514_v6 = vpop.f32.mrf.mxu3  ;;  %v708_v11 = vrot.slane %v548_v32, 1 }
  0xe6   :  { %v377_v45 = vpop.f32.mrf.mxu0  ;;  %v1709_v48 = vmax.f32 %v819_v15, %v851_v38 }
  0xe7   :  { %v378_v54 = vadd.f32 %v1608_v50, %v377_v45  ;;  %v660_v47 = vsel %vm339_vm0, 0.0, %v596_v57  ;;  %v757_v63 = vsel %vm748_vm3, %v692_v59, 0.0  ;;  %v421_v45 = vadd.f32 %v1608_v50, %v420_v41 }
  0xe9   :  { %v467_v60 = vadd.f32 %v466_v56, %v378_v54  ;;  %v789_v56 = vmax.f32 %v660_v47, %v757_v63 }
  0xeb   :  { %v533_v61 = vmax.f32 %v467_v60, 0.0  ;;  %v821_v13 = vmax.f32 %v532_v39, %v789_v56  ;;  %v612_v60 = vrot.slane %v548_v32, 7  ;;  %v773_v56 = vsel %vm748_vm3, %v708_v11, 0.0 }
  0xec   :  { %v1712_v21 = vpop.f32.mrf.mxu1  ;;  %v422_v62 = vpop.f32.mrf.mxu2 }
  0xed   :  { %v597_v40 = vrot.slane %v533_v61, 7  ;;  %v693_v49 = vrot.slane %v533_v61, 1  ;;  %v516_v31 = vpop.f32.mrf.mxu3 }
  0xee   :  { %v380_v1 = vpop.f32.mrf.mxu0 }
  0xef   :  { %v661_v3 = vsel %vm339_vm0, 0.0, %v597_v40  ;;  %v758_v53 = vsel %vm748_vm3, %v693_v49, 0.0  ;;  %v381_v0 = vadd.f32 %v1608_v50, %v380_v1  ;;  %v423_v49 = vadd.f32 %v1608_v50, %v422_v62 }
  0xf0   :  { %v790_v52 = vmax.f32 %v661_v3, %v758_v53  ;;  %v510_v3 = vadd.f32 %v1689_v20, %v421_v45 }
  0xf1   :  { %v470_v7 = vadd.f32 %v469_v19, %v381_v0  ;;  %v512_v62 = vadd.f32 %v1707_v44, %v423_v49 }
  0xf2   :  { %v822_v9 = vmax.f32 %v533_v61, %v790_v52  ;;  %v418_v61 = vadd.f32 %v1608_v50, %v1695_v27  ;;  %v676_v52 = vsel %vm339_vm0, 0.0, %v612_v60 }
  0xf3   :  { %v534_v10 = vmax.f32 %v470_v7, 0.0  ;;  %v1760_v44 = vmax.f32 %v512_v62, 0.0 }
  0xf4   :  { %v1719_v12 = vpop.f32.mrf.mxu1  ;;  %v853_v15 = vmax.f32 %v822_v9, 0.0  ;;  %v425_v24 = vpop.f32.mrf.mxu2  ;;  %v507_v0 = vadd.f32 %v1668_v46, %v418_v61 }
  0xf5   :  { %v598_v16 = vrot.slane %v534_v10, 7  ;;  %v694_v23 = vrot.slane %v534_v10, 1  ;;  %v426_v1 = vadd.f32 %v1608_v50, %v425_v24  ;;  %v615_v60 = vrot.slane %v1760_v44, 7 }
  0xf6   :  { %v382_v18 = vpop.f32.mrf.mxu0  ;;  %v1721_v25 = vmax.f32 %v821_v13, %v853_v15  ;;  %v1754_v24 = vmax.f32 %v507_v0, 0.0 }
  0xf7   :  { %v662_v28 = vsel %vm339_vm0, 0.0, %v598_v16  ;;  %v759_v29 = vsel %vm748_vm3, %v694_v23, 0.0  ;;  %v383_v17 = vadd.f32 %v1608_v50, %v382_v18  ;;  %v1752_v16 = vmax.f32 %v510_v3, 0.0 }
  0xf8   :  { %v791_v30 = vmax.f32 %v662_v28, %v759_v29  ;;  %v805_v28 = vmax.f32 %v676_v52, %v773_v56  ;;  %v613_v45 = vrot.slane %v1754_v24, 7 }
  0xf9   :  { %v472_v19 = vadd.f32 %v471_v37, %v383_v17 }
  0xfa   :  { %v1727_v36 = vmax.f32 %v534_v10, %v791_v30  ;;  %v519_v10 = vpop.f32.mrf.mxu3 }
  0xfb   :  { %v535_v14 = vmax.f32 %v472_v19, 0.0  ;;  %v1771_v19 = vadd.f32 %v1608_v50, %v1615_v5  ;;  %v711_v5 = vrot.slane %v1760_v44, 1 }
  0xfc   :  { %v1729_v38 = vpop.f32.mrf.mxu1  ;;  %v854_v39 = vmax.f32 %v821_v13, %v1727_v36  ;;  %v427_v59 = vpop.f32.mrf.mxu2  ;;  %v515_v13 = vadd.f32 %v514_v6, %v426_v1  ;;  %v1765_v6 = vadd.f32 %v1608_v50, %v1612_v58  ;;  %v1779_v58 = vmax.f32 %v548_v32, %v805_v28 }
  0xfd   :  { %v599_v54 = vrot.slane %v535_v14, 7  ;;  %v695_v57 = vrot.slane %v535_v14, 1  ;;  %v428_v53 = vadd.f32 %v1608_v50, %v427_v59  ;;  %v709_v59 = vrot.slane %v1754_v24, 1 }
  0xfe   :  { %v385_v37 = vpop.f32.mrf.mxu0  ;;  %v1735_v40 = vmax.f32 %v822_v9, %v854_v39 }
  0xff   :  { %v663_v47 = vsel %vm339_vm0, 0.0, %v599_v54  ;;  %v760_v63 = vsel %vm748_vm3, %v695_v57, 0.0  ;;  %v517_v20 = vadd.f32 %v516_v31, %v428_v53  ;;  %v386_v17 = vadd.f32 %v1608_v50, %v385_v37 }
 0x100   :  { %v792_v41 = vmax.f32 %v663_v47, %v760_v63  ;;  %v614_v31 = vrot.slane %v1752_v16, 7  ;;  %v710_v54 = vrot.slane %v1752_v16, 1 }
 0x101   :  { %v475_v61 = vadd.f32 %v1712_v21, %v386_v17 }
 0x102   :  { %v1744_v27 = vmax.f32 %v535_v14, %v792_v41  ;;  %v1774_v14 = vmax.f32 %v517_v20, 0.0  ;;  %v678_v1 = vsel %vm339_vm0, 0.0, %v614_v31  ;;  %v521_v0 = vpop.f32.mrf.mxu3  ;;  %v775_v21 = vsel %vm748_vm3, %v710_v54, 0.0 }
 0x103   :  { %v1799_v20 = vmax.f32 %v475_v61, 0.0  ;;  %v677_v54 = vsel %vm339_vm0, 0.0, %v613_v45 }
 0x104   :  { %v1749_v7 = vpop.f32.mrf.mxu1  ;;  %v855_v15 = vmax.f32 %v822_v9, %v1744_v27  ;;  %v430_v23 = vpop.f32.mrf.mxu2  ;;  %v1767_v9 = vmax.f32 %v515_v13, 0.0  ;;  %v617_v32 = vrot.slane %v1774_v14, 7  ;;  %v713_v41 = vrot.slane %v1774_v14, 1 }
 0x105   :  { %v431_v46 = vadd.f32 %v1608_v50, %v430_v23  ;;  %v679_v13 = vsel %vm339_vm0, 0.0, %v615_v60  ;;  %v774_v60 = vsel %vm748_vm3, %v709_v59, 0.0 }
 0x106   :  { %v387_v18 = vpop.f32.mrf.mxu0  ;;  %v1758_v29 = vmax.f32 %v1727_v36, %v855_v15  ;;  %v616_v11 = vrot.slane %v1767_v9, 7  ;;  %v712_v49 = vrot.slane %v1767_v9, 1  ;;  %v776_v15 = vsel %vm748_vm3, %v711_v5, 0.0 }
 0x107   :  { %v520_v30 = vadd.f32 %v519_v10, %v431_v46  ;;  %v388_v39 = vadd.f32 %v1608_v50, %v387_v18  ;;  %v681_v17 = vsel %vm339_vm0, 0.0, %v617_v32  ;;  %v807_v5 = vmax.f32 %v678_v1, %v775_v21 }
 0x108   :  { %v777_v46 = vsel %vm748_vm3, %v712_v49, 0.0  ;;  %v600_v49 = vrot.slane %v1799_v20, 7 }
 0x109   :  { %v554_v57 = vmax.f32 %v520_v30, 0.0  ;;  %v477_v3 = vadd.f32 %v1719_v12, %v388_v39  ;;  %v680_v12 = vsel %vm339_vm0, 0.0, %v616_v11  ;;  %v778_v30 = vsel %vm748_vm3, %v713_v41, 0.0 }
 0x10a   :  { %v809_v11 = vmax.f32 %v680_v12, %v777_v46  ;;  %v810_v32 = vmax.f32 %v681_v17, %v778_v30  ;;  %v806_v12 = vmax.f32 %v677_v54, %v774_v60  ;;  %v1823_v46 = vmax.f32 %v1752_v16, %v807_v5 }
 0x10b   :  { %v618_v47 = vrot.slane %v554_v57, 7  ;;  %v714_v63 = vrot.slane %v554_v57, 1  ;;  %v1806_v31 = vmax.f32 %v477_v3, 0.0  ;;  %v664_v17 = vsel %vm339_vm0, 0.0, %v600_v49 }
 0x10c   :  { %v1785_v37 = vpop.f32.mrf.mxu1  ;;  %v432_v53 = vpop.f32.mrf.mxu2 }
 0x10d   :  { %v682_v52 = vsel %vm339_vm0, 0.0, %v618_v47  ;;  %v779_v56 = vsel %vm748_vm3, %v714_v63, 0.0  ;;  %v433_v62 = vadd.f32 %v1608_v50, %v432_v53  ;;  %v808_v47 = vmax.f32 %v679_v13, %v776_v15 }
 0x10e   :  { %v390_v10 = vpop.f32.mrf.mxu0  ;;  %v811_v18 = vmax.f32 %v682_v52, %v779_v56  ;;  %v696_v52 = vrot.slane %v1799_v20, 1  ;;  %v697_v59 = vrot.slane %v1806_v31, 1 }
 0x10f   :  { %v391_v23 = vadd.f32 %v1608_v50, %v390_v10  ;;  %v522_v28 = vadd.f32 %v521_v0, %v433_v62 }
 0x110   :  { %v843_v0 = vmax.f32 %v554_v57, %v811_v18  ;;  %v841_v18 = vmax.f32 %v1767_v9, %v809_v11  ;;  %v761_v30 = vsel %vm748_vm3, %v696_v52, 0.0  ;;  %v762_v54 = vsel %vm748_vm3, %v697_v59, 0.0 }
 0x111   :  { %v480_v39 = vadd.f32 %v1729_v38, %v391_v23  ;;  %v555_v61 = vmax.f32 %v522_v28, 0.0  ;;  %v601_v38 = vrot.slane %v1806_v31, 7  ;;  %v842_v28 = vmax.f32 %v1774_v14, %v810_v32 }
 0x112   :  { %v876_v10 = vmax.f32 %v843_v0, 0.0  ;;  %v874_v11 = vmax.f32 %v841_v18, %v843_v0  ;;  %v1834_v14 = vmax.f32 %v1754_v24, %v806_v12  ;;  %v793_v49 = vmax.f32 %v664_v17, %v761_v30 }
 0x113   :  { %v538_v63 = vmax.f32 %v480_v39, 0.0  ;;  %v619_v41 = vrot.slane %v555_v61, 7  ;;  %v715_v3 = vrot.slane %v555_v61, 1  ;;  %v870_v24 = vmax.f32 %v1779_v58, %v1823_v46 }
 0x114   :  { %v1812_v53 = vpop.f32.mrf.mxu1  ;;  %v825_v12 = vmax.f32 %v1799_v20, %v793_v49 }
 0x115   :  { %v602_v45 = vrot.slane %v538_v63, 7  ;;  %v698_v56 = vrot.slane %v538_v63, 1  ;;  %v683_v21 = vsel %vm339_vm0, 0.0, %v619_v41  ;;  %v780_v62 = vsel %vm748_vm3, %v715_v3, 0.0 }
 0x116   :  { %v392_v1 = vpop.f32.mrf.mxu0  ;;  %v812_v23 = vmax.f32 %v683_v21, %v780_v62  ;;  %v840_v3 = vmax.f32 %v1760_v44, %v808_v47  ;;  %v872_v62 = vmax.f32 %v1823_v46, %v841_v18 }
 0x117   :  { %v666_v13 = vsel %vm339_vm0, 0.0, %v602_v45  ;;  %v763_v57 = vsel %vm748_vm3, %v698_v56, 0.0  ;;  %v393_v15 = vadd.f32 %v1608_v50, %v392_v1  ;;  %v665_v45 = vsel %vm339_vm0, 0.0, %v601_v38  ;;  %v909_v38 = vld [vmem:[%s1921_s4] sm:$0xff] }
 0x118   :  { %v844_v41 = vmax.f32 %v555_v61, %v812_v23  ;;  %v795_v60 = vmax.f32 %v666_v13, %v763_v57  ;;  %v794_v61 = vmax.f32 %v665_v45, %v762_v54  ;;  %911 = vst [vmem:[#allocation1] ss:$2 sm:$0xff] %v909_v38 }
 0x119   :  { %v482_v39 = vadd.f32 %v1749_v7, %v393_v15  ;;  %v873_v7 = vmax.f32 %v840_v3, %v842_v28 }
 0x11a   :  { %v908_v56 = vmax.f32 %v844_v41, %v876_v10  ;;  %v875_v9 = vmax.f32 %v842_v28, %v844_v41  ;;  %v827_v59 = vmax.f32 %v538_v63, %v795_v60  ;;  %v906_v10 = vmax.f32 %v842_v28, %v874_v11 }
 0x11b   :  { %v539_v16 = vmax.f32 %v482_v39, 0.0  ;;  %v871_v63 = vmax.f32 %v1834_v14, %v840_v3  ;;  %v826_v17 = vmax.f32 %v1806_v31, %v794_v61  ;;  %v905_v39 = vmax.f32 %v841_v18, %v873_v7 }
 0x11c   :  { %v489_v5 = vpop.f32.mrf.mxu1  ;;  %936 = vmatpush.msrb.mxu3 %v908_v56  ;;  %v907_v47 = vmax.f32 %v843_v0, %v875_v9  ;;  %v860_v54 = vmax.f32 %v827_v59, 0.0  ;;  %v904_v9 = vmax.f32 %v840_v3, %v872_v62  ;;  %v858_v31 = vmax.f32 %v825_v12, %v827_v59 }
 0x11d   :  { %v490_v32 = vadd.f32 %v489_v5, %v1765_v6  ;;  %v603_v52 = vrot.slane %v539_v16, 7  ;;  %v699_v44 = vrot.slane %v539_v16, 1  ;;  %v869_v18 = vmax.f32 %v1834_v14, 0.0 }
 0x11e   :  { %v395_v21 = vpop.f32.mrf.mxu0  ;;  %937 = vmatpush.msrb.mxu3 %v907_v47  ;;  %v857_v3 = vmax.f32 %v1744_v27, %v826_v17  ;;  %v856_v62 = vmax.f32 %v1727_v36, %v825_v12 }
 0x11f   :  { %v542_v1 = vmax.f32 %v490_v32, 0.0  ;;  %v396_v6 = vadd.f32 %v1608_v50, %v395_v21  ;;  %v667_v13 = vsel %vm339_vm0, 0.0, %v603_v52  ;;  %v764_v0 = vsel %vm748_vm3, %v699_v44, 0.0 }
 0x120   :  { %v796_v23 = vmax.f32 %v667_v13, %v764_v0  ;;  %938 = vmatpush.msrb.mxu3 %v906_v10  ;;  %v902_v52 = vmax.f32 %v1834_v14, %v870_v24  ;;  %v890_v21 = vmax.f32 %v826_v17, %v858_v31  ;;  %v901_v14 = vmax.f32 %v1779_v58, %v869_v18 }
 0x121   :  { %v606_v57 = vrot.slane %v542_v1, 7  ;;  %v702_v15 = vrot.slane %v542_v1, 1  ;;  %v485_v30 = vadd.f32 %v1785_v37, %v396_v6  ;;  %v903_v37 = vmax.f32 %v1823_v46, %v871_v63 }
 0x122   :  { %v828_v45 = vmax.f32 %v539_v16, %v796_v23  ;;  %939 = vmatpush.msrb.mxu3 %v905_v39  ;;  %v888_v36 = vmax.f32 %v1744_v27, %v856_v62 }
 0x123   :  { %v670_v41 = vsel %vm339_vm0, 0.0, %v606_v57  ;;  %v767_v28 = vsel %vm748_vm3, %v702_v15, 0.0  ;;  %v540_v5 = vmax.f32 %v485_v30, 0.0 }
 0x124   :  { %v799_v60 = vmax.f32 %v670_v41, %v767_v28  ;;  %v491_v56 = vpop.f32.mrf.mxu1  ;;  %v892_v20 = vmax.f32 %v828_v45, %v860_v54  ;;  %v859_v49 = vmax.f32 %v826_v17, %v828_v45  ;;  %940 = vmatpush.msrb.mxu3 %v904_v9  ;;  %v1287_v9 = vld [vmem:[%s1923_s6] ss:$0 sm:$0xff] }
 0x125   :  { %v492_v11 = vadd.f32 %v491_v56, %v1771_v19  ;;  %v604_v44 = vrot.slane %v540_v5, 7  ;;  %v700_v19 = vrot.slane %v540_v5, 1 }
 0x126   :  { %v1853_v32 = vmax.f32 %v542_v1, %v799_v60  ;;  %v397_v16 = vpop.f32.mrf.mxu0  ;;  %916 = vmatpush.msrb.mxu2 %v892_v20  ;;  %v891_v61 = vmax.f32 %v827_v59, %v859_v49  ;;  %941 = vmatpush.msrb.mxu3 %v903_v37 }
 0x127   :  { %v543_v7 = vmax.f32 %v492_v11, 0.0  ;;  %v398_v47 = vadd.f32 %v1608_v50, %v397_v16  ;;  %v889_v50 = vmax.f32 %v825_v12, %v857_v3  ;;  %v668_v0 = vsel %vm339_vm0, 0.0, %v604_v44 }
 0x128   :  { %v864_v38 = vmax.f32 %v1853_v32, %v1665_v42  ;;  %917 = vmatpush.msrb.mxu2 %v891_v61  ;;  %942 = vmatpush.msrb.mxu3 %v902_v52  ;;  %v765_v57 = vsel %vm748_vm3, %v700_v19, 0.0 }
 0x129   :  { %v607_v1 = vrot.slane %v543_v7, 7  ;;  %v703_v46 = vrot.slane %v543_v7, 1  ;;  %v487_v59 = vadd.f32 %v1812_v53, %v398_v47  ;;  %v797_v58 = vmax.f32 %v668_v0, %v765_v57 }
 0x12a   :  { %918 = vmatpush.msrb.mxu2 %v890_v21  ;;  %943 = vmatpush.msrb.mxu3 %v901_v14 }
 0x12b   :  { %v671_v24 = vsel %vm339_vm0, 0.0, %v607_v1  ;;  %v768_v6 = vsel %vm748_vm3, %v703_v46, 0.0  ;;  %v541_v13 = vmax.f32 %v487_v59, 0.0 }
 0x12c   :  { %v800_v10 = vmax.f32 %v671_v24, %v768_v6  ;;  %919 = vmatpush.msrb.mxu2 %v889_v50  ;;  %944 = vmatpush.msrb.mxu3 %v1691_v22  ;;  %v829_v22 = vmax.f32 %v540_v5, %v797_v58 }
 0x12d   :  { %v605_v15 = vrot.slane %v541_v13, 7  ;;  %v701_v23 = vrot.slane %v541_v13, 1 }
 0x12e   :  { %v832_v53 = vmax.f32 %v543_v7, %v800_v10  ;;  %920 = vmatpush.msrb.mxu2 %v888_v36  ;;  %945 = vmatpush.msrb.mxu3 %v1697_v8  ;;  %v862_v8 = vmax.f32 %v829_v22, %v1853_v32 }
 0x12f   :  { %v669_v63 = vsel %vm339_vm0, 0.0, %v605_v15  ;;  %v766_v12 = vsel %vm748_vm3, %v701_v23, 0.0 }
 0x130   :  { %v865_v17 = vmax.f32 %v832_v53, %v1670_v51  ;;  %v896_v30 = vmax.f32 %v832_v53, %v864_v38  ;;  %v798_v39 = vmax.f32 %v669_v63, %v766_v12  ;;  %921 = vmatpush.msrb.mxu2 %v1758_v29  ;;  %946 = vmatpush.msrb.mxu3 %v1675_v35 }
 0x132   :  { %v897_v27 = vmax.f32 %v1665_v42, %v865_v17  ;;  %v830_v41 = vmax.f32 %v541_v13, %v798_v39  ;;  %922 = vmatpush.msrb.mxu2 %v1735_v40  ;;  %v913_v40 = vld.sshfl [vmem:[#allocation1 + $0x8] sm:$0xff pattern:$0x75316420] }
 0x134   :  { %947 = vmatpush.msrb.mxu3 %v897_v27  ;;  %923 = vmatpush.msrb.mxu2 %v1721_v25  ;;  %v863_v28 = vmax.f32 %v830_v41, %v832_v53  ;;  %v861_v29 = vmax.f32 %v830_v41, 0.0  ;;  %v894_v42 = vmax.f32 %v830_v41, %v862_v8  ;;  %v990_v25 = vld [vmem:[%s1924_s7] sm:$0xf] }
 0x136   :  { %948 = vmatpush.msrb.mxu3 %v896_v30  ;;  %924 = vmatpush.msrb.mxu2 %v1705_v33  ;;  %v895_v51 = vmax.f32 %v1853_v32, %v863_v28  ;;  %v893_v35 = vmax.f32 %v829_v22, %v861_v29  ;;  %v989_v33 = vld [vmem:[%s1918_s1] sm:$0xf] }
 0x138   :  { %925 = vmatpush.msrb.mxu2 %v1709_v48  ;;  %949 = vmatpush.msrb.mxu3 %v895_v51  ;;  %v959_v48 = vld [vmem:[%s1922_s5 + $0x18] sm:$0xff] }
 0x13a   :  { %926 = vmatpush.msrb.mxu2 %v1699_v55  ;;  %950 = vmatpush.msrb.mxu3 %v894_v42  ;;  %v912_v55 = vld.sshfl [vmem:[#allocation1] sm:$0xff pattern:$0x75316420] }
 0x13c   :  { %927 = vmatpush.msrb.mxu2 %v1681_v2  ;;  %951 = vmatpush.msrb.mxu3 %v893_v35 }
 0x13d   :  { %952 = vmatmul.f32.vlgmr.msrb.gmra.mxu3 %v913_v40 }
 0x13e   :  { %928 = vmatpush.msrb.mxu2 %v1660_v34  ;;  %1229 = vmatpush.msk.msra.mxu3 %vm999_vm4, %v990_v25  ;;  %v956_v34 = vld [vmem:[%s1922_s5] sm:$0xff] }
 0x140   :  { %929 = vmatpush.msrb.mxu2 %v1642_v4  ;;  %v958_v4 = vld [vmem:[%s1922_s5 + $0x10] sm:$0xff] }
 0x142   :  { %930 = vmatpush.msrb.mxu2 %v1631_v43  ;;  %v957_v43 = vld [vmem:[%s1922_s5 + $0x8] sm:$0xff]  ;;  %s1316_s5 = smov [#allocation2]  }
 0x143   :  { %s1037_s20 = sshll.u32 %s1316_s5, 4  ;;  %s1038_s20 = int_to_ptr.vmem [resolvable:$true] %s1037_s20 }
 0x144   :  { %931 = vmatpush.msrb.mxu2 %v1623_v26  ;;  %v1286_v26 = vld [vmem:[%s1925_s8] ss:$0 sm:$0xff]  ;;  %s1039_s8 = sshll.u32 %s1926_s9, 4  ;;  %s1040_s8 = int_to_ptr.hbm [resolvable:$true] %s1039_s8 }
 0x145   :  { %932 = vmatmul.f32.vlgmr.msrb.gmra.mxu2 %v912_v55  ;;  %1230 = vmatmul.msk.f32.vlgmr.msra.gmra.mxu3 %vm995_vm5, %v989_v33 }
 0x146   :  { %980 = vmatpush.msra.mxu2 %v959_v48 }
 0x148   :  { %981 = vmatpush.msra.mxu2 %v958_v4 }
 0x14a   :  { %982 = vmatpush.msra.mxu2 %v957_v43 }
 0x14c   :  { %983 = vmatpush.msra.mxu2 %v956_v34 }
 0x1c0   :  { %v953_v2 = vpop.f32.mrf.mxu3 }
 0x1c8   :  { %v933_v45 = vpop.f32.mrf.mxu2  ;;  %v1020_v54 = vpop.f32.mrf.mxu3 }
 0x1c9   :  { %v954_v60 = vadd.f32 %v953_v2, %v933_v45  ;;  %v1021_v5 = vadd.f32 %v1286_v26, %v1020_v54 }
 0x1cb   :  { %1228 = vmatmul.msk.f32.vlgmr.msra.gmra.mxu2 %vm964_vm6, %v954_v60  ;;  %v1023_v56 = vmax.f32 %v1021_v5, 0.0 }
 0x1cd   :  { %1025 = vrot.lane.b32.xlu0 %v1023_v56, %s1315_s17 }
 0x23f   :  { %v1026_v49 = vpop.permute.xlu0 %1025 }
 0x24e   :  { %v985_v11 = vpop.f32.mrf.mxu2 }
 0x24f   :  { %v986_v20 = vadd.f32 %v1287_v9, %v985_v11 }
 0x251   :  { %v988_v31 = vmax.f32 %v986_v20, 0.0 }
 0x253   :  { %v1029_v32 = vsel %vm1028_vm7, %v988_v31, %v1026_v49 }
 0x254   :  { %1031 = vst.msk [vmem:[#allocation2] sm:$0xf] %vm1030_vm8, %v1029_v32 }
 0x255   :  { %1042 = dma.vmem_to_hbm [thread:$0]  %s1038_s20, 64, %s1040_s8, [#allocation3]  }
 0x256   :  { %1312 = dma.done.wait [#allocation3], 64  }
 0x257   :  { %1313 = vsyncadd [#allocation3], 4294967232 }
 0x258   :  { %1047 = vsyncpa [#allocation3], 1 }

</bundles_post_ra>
